<compile_context>
chip_gen: v6e
topology: v6e:2x2x1
jax: 0.10.0
libtpu: 0.0.40
codegen_flags: <defaults>
</compile_context>

<pallas_src>
import functools

import jax
import jax.numpy as jnp
from jax.experimental import pallas as pl
from jax.experimental.pallas import tpu as pltpu

EPS = 1e-6


def _layernorm(h, gamma, beta):
    mu = jnp.mean(h, axis=-1, keepdims=True)
    var = jnp.mean((h - mu) ** 2, axis=-1, keepdims=True)
    # rsqrt goes to the (otherwise idle) EUP slot.
    return (h - mu) * jax.lax.rsqrt(var + EPS) * gamma + beta


def projection_head_kernel(
    x_ref,
    w1_ref, b1_ref, g1_ref, be1_ref,
    w2_ref, b2_ref, g2_ref, be2_ref,
    w3_ref, b3_ref,
    ft_ref, part_ref,
):
    x = x_ref[...]                                      # (tile_b, F) bf16

    # Linear(feature_dim, hid) + LayerNorm(eps=1e-6) + ReLU  (Dropout p=0 -> id)
    h = jnp.dot(x, w1_ref[...], preferred_element_type=jnp.float32) + b1_ref[...]
    h = jnp.maximum(_layernorm(h, g1_ref[...], be1_ref[...]), 0.0)

    # Linear(hid, hid) + LayerNorm + ReLU
    h = jnp.dot(h.astype(jnp.bfloat16), w2_ref[...],
                preferred_element_type=jnp.float32) + b2_ref[...]
    h = jnp.maximum(_layernorm(h, g2_ref[...], be2_ref[...]), 0.0)

    # last_linear: Linear(hid, dim)
    f = jnp.dot(h.astype(jnp.bfloat16), w3_ref[...],
                preferred_element_type=jnp.float32) + b3_ref[...]

    # norm = Identity -> ft == f. Single lane-dense store.
    ft_ref[...] = f.astype(ft_ref.dtype)

    out_dim = f.shape[-1]
    # Per-tile partials for the std statistics; finalized in the wrapper so the
    # batch grid axis stays "parallel" (no cross-tile accumulator in-kernel).
    col_sum = jnp.sum(f, axis=0, keepdims=True)               # (1, O)
    col_sq = jnp.sum(f * f, axis=0, keepdims=True)            # (1, O)
    mu_r = jnp.mean(f, axis=-1, keepdims=True)
    row_std = jnp.sqrt(jnp.mean((f - mu_r) ** 2, axis=-1, keepdims=True))
    row_sum = jnp.sum(row_std)                                # sum of per-row stds
    row_row = jnp.full((1, out_dim), row_sum, dtype=jnp.float32)
    pad = jnp.zeros((5, out_dim), jnp.float32)
    part_ref[0] = jnp.concatenate([col_sum, col_sq, row_row, pad], axis=0)


@functools.partial(jax.jit, static_argnames=("tile_b",))
def projection_head_forward(x, params, tile_b=256):
    B, F = x.shape
    H = params["w1"].shape[1]
    O = params["w3"].shape[1]

    tile_b = min(tile_b, B)
    # TODO(synk): ragged batches (B % tile_b != 0) would need padding + masked
    #             stats partials; not needed for this configuration.
    assert B % tile_b == 0, "batch must be divisible by tile_b"
    num_tiles = B // tile_b

    f32, bf16 = jnp.float32, jnp.bfloat16
    # bf16 MXU operands (accumulation stays f32 inside the kernel).
    x_bf = x.astype(bf16)
    w1 = params["w1"].astype(bf16)
    w2 = params["w2"].astype(bf16)
    w3 = params["w3"].astype(bf16)

    def resident(shape):
        return pl.BlockSpec(shape, lambda i: (0,) * len(shape))

    in_specs = [
        pl.BlockSpec((tile_b, F), lambda i: (i, 0)),   # x tile (streamed)
        resident((F, H)), resident((1, H)), resident((1, H)), resident((1, H)),
        resident((H, H)), resident((1, H)), resident((1, H)), resident((1, H)),
        resident((H, O)), resident((1, O)),
    ]
    out_specs = (
        pl.BlockSpec((tile_b, O), lambda i: (i, 0)),      # ft (lane-dense)
        pl.BlockSpec((1, 8, O), lambda i: (i, 0, 0)),     # per-tile partials
    )

    flops = 2 * B * (F * H + H * H + H * O)
    bytes_accessed = (
        x_bf.size * 2
        + (w1.size + w2.size + w3.size) * 2
        + 4 * (6 * H + O)          # biases / gamma / beta (f32)
        + B * O * 4                # ft out
        + num_tiles * 8 * O * 4    # partials out
    )
    cost = pl.CostEstimate(flops=flops, transcendentals=3 * B,
                           bytes_accessed=bytes_accessed)

    ft, parts = pl.pallas_call(
        projection_head_kernel,
        grid=(num_tiles,),
        in_specs=in_specs,
        out_specs=out_specs,
        out_shape=(
            jax.ShapeDtypeStruct((B, O), f32),
            jax.ShapeDtypeStruct((num_tiles, 8, O), f32),
        ),
        compiler_params=pltpu.CompilerParams(
            dimension_semantics=("parallel",)),
        cost_estimate=cost,
    )(
        x_bf,
        w1, params["b1"], params["g1"], params["be1"],
        w2, params["b2"], params["g2"], params["be2"],
        w3, params["b3"],
    )

    # Finalize the std statistics from per-tile partials (tiny, pure JAX).
    col_sum = jnp.sum(parts[:, 0, :], axis=0)
    col_sq = jnp.sum(parts[:, 1, :], axis=0)
    row_sum = jnp.sum(parts[:, 2, 0])
    col_mean = col_sum / B
    col_var = jnp.maximum(col_sq / B - col_mean * col_mean, 0.0)
    f_column_std = jnp.mean(jnp.sqrt(col_var))
    f_row_std = row_sum / B
    # ft = Identity(f): ft stats duplicate f stats (computed once).
    stats = jnp.stack([f_column_std, f_row_std, f_column_std, f_row_std])
    return ft, stats


def reference_forward(x, p):
    h = x @ p["w1"] + p["b1"]
    h = jnp.maximum(_layernorm(h, p["g1"], p["be1"]), 0.0)
    h = h @ p["w2"] + p["b2"]
    h = jnp.maximum(_layernorm(h, p["g2"], p["be2"]), 0.0)
    f = h @ p["w3"] + p["b3"]

    def std_mean(a, axis):  # torch .std(dim=axis, unbiased=False).mean()
        m = jnp.mean(a, axis=axis, keepdims=True)
        return jnp.mean(jnp.sqrt(jnp.mean((a - m) ** 2, axis=axis)))

    stats = jnp.stack([std_mean(f, 0), std_mean(f, 1),
                       std_mean(f, 0), std_mean(f, 1)])
    return f, stats


def init_params(key, feature_dim, hid_dim, out_dim):
    # vit-style init is trunc_normal(0.02) weights / zero biases / LN gamma=1,
    # beta=0; here biases & affine params get small random values so the
    # bias-add and LN-affine code paths are actually exercised numerically.
    ks = jax.random.split(key, 10)
    f32 = jnp.float32
    return {
        "w1": 0.02 * jax.random.normal(ks[0], (feature_dim, hid_dim), f32),
        "b1": 0.1 * jax.random.normal(ks[1], (1, hid_dim), f32),
        "g1": 1.0 + 0.1 * jax.random.normal(ks[2], (1, hid_dim), f32),
        "be1": 0.1 * jax.random.normal(ks[3], (1, hid_dim), f32),
        "w2": 0.02 * jax.random.normal(ks[4], (hid_dim, hid_dim), f32),
        "b2": 0.1 * jax.random.normal(ks[5], (1, hid_dim), f32),
        "g2": 1.0 + 0.1 * jax.random.normal(ks[6], (1, hid_dim), f32),
        "be2": 0.1 * jax.random.normal(ks[7], (1, hid_dim), f32),
        "w3": 0.02 * jax.random.normal(ks[8], (hid_dim, out_dim), f32),
        "b3": 0.1 * jax.random.normal(ks[9], (1, out_dim), f32),
    }


if __name__ == "__main__":
    B, FEATURE_DIM, HID_DIM, OUT_DIM = 64, 256, 128, 128
    TILE_B = 16  # exercises a 4-step batch grid with resident weights

    key = jax.random.PRNGKey(0)
    kx, kp = jax.random.split(key)
    x = jax.random.normal(kx, (B, FEATURE_DIM), jnp.float32)
    params = init_params(kp, FEATURE_DIM, HID_DIM, OUT_DIM)

    ft, stats = projection_head_forward(x, params, tile_b=TILE_B)
    ft = jax.block_until_ready(ft)
    stats = jax.block_until_ready(stats)

    ft_ref, stats_ref = reference_forward(x, params)
    assert ft.shape == (B, OUT_DIM) and ft.dtype == jnp.float32
    # bf16 MXU operands (f32 accumulation) vs the f32 reference -> loosened tol.
    assert jnp.allclose(ft, ft_ref, rtol=2e-2, atol=2e-2), (
        "max |diff| = %f" % float(jnp.max(jnp.abs(ft - ft_ref))))
    assert jnp.allclose(stats, stats_ref, rtol=2e-2, atol=2e-2), (
        str(stats) + " vs " + str(stats_ref))

    print("KERNEL_OK")
</pallas_src>

<mosaic_0001>
module attributes {stable_mosaic.version = 11 : i64} {
  func.func @projection_head_kernel(%arg0: i32, %arg1: memref<16x256xbf16, #tpu.memory_space<vmem>>, %arg2: memref<256x128xbf16, #tpu.memory_space<vmem>>, %arg3: memref<1x128xf32, #tpu.memory_space<vmem>>, %arg4: memref<1x128xf32, #tpu.memory_space<vmem>>, %arg5: memref<1x128xf32, #tpu.memory_space<vmem>>, %arg6: memref<128x128xbf16, #tpu.memory_space<vmem>>, %arg7: memref<1x128xf32, #tpu.memory_space<vmem>>, %arg8: memref<1x128xf32, #tpu.memory_space<vmem>>, %arg9: memref<1x128xf32, #tpu.memory_space<vmem>>, %arg10: memref<128x128xbf16, #tpu.memory_space<vmem>>, %arg11: memref<1x128xf32, #tpu.memory_space<vmem>>, %arg12: memref<16x128xf32, #tpu.memory_space<vmem>>, %arg13: memref<1x8x128xf32, #tpu.memory_space<vmem>>) attributes {dimension_semantics = [#tpu.dimension_semantics<parallel>], iteration_bounds = array<i64: 4>, scalar_prefetch = 0 : i64, scratch_operands = 0 : i64, tpu.core_type = #tpu.core_type<tc>, window_params = [{transform_indices = @transform_0, window_bounds = array<i64: 16, 256>}, {pipeline_mode = #tpu.pipeline_mode<synchronous>, transform_indices = @transform_1, window_bounds = array<i64: 256, 128>}, {pipeline_mode = #tpu.pipeline_mode<synchronous>, transform_indices = @transform_2, window_bounds = array<i64: 1, 128>}, {pipeline_mode = #tpu.pipeline_mode<synchronous>, transform_indices = @transform_3, window_bounds = array<i64: 1, 128>}, {pipeline_mode = #tpu.pipeline_mode<synchronous>, transform_indices = @transform_4, window_bounds = array<i64: 1, 128>}, {pipeline_mode = #tpu.pipeline_mode<synchronous>, transform_indices = @transform_5, window_bounds = array<i64: 128, 128>}, {pipeline_mode = #tpu.pipeline_mode<synchronous>, transform_indices = @transform_6, window_bounds = array<i64: 1, 128>}, {pipeline_mode = #tpu.pipeline_mode<synchronous>, transform_indices = @transform_7, window_bounds = array<i64: 1, 128>}, {pipeline_mode = #tpu.pipeline_mode<synchronous>, transform_indices = @transform_8, window_bounds = array<i64: 1, 128>}, {pipeline_mode = #tpu.pipeline_mode<synchronous>, transform_indices = @transform_9, window_bounds = array<i64: 128, 128>}, {pipeline_mode = #tpu.pipeline_mode<synchronous>, transform_indices = @transform_10, window_bounds = array<i64: 1, 128>}, {transform_indices = @transform_11, window_bounds = array<i64: 16, 128>}, {transform_indices = @transform_12, window_bounds = array<i64: 1, 8, 128>}]} {
    %c0 = arith.constant 0 : index
    %c0_0 = arith.constant 0 : index
    %0 = vector.load %arg1[%c0, %c0_0] : memref<16x256xbf16, #tpu.memory_space<vmem>>, vector<16x256xbf16>
    %c0_1 = arith.constant 0 : index
    %c0_2 = arith.constant 0 : index
    %1 = vector.load %arg2[%c0_1, %c0_2] : memref<256x128xbf16, #tpu.memory_space<vmem>>, vector<256x128xbf16>
    %cst = arith.constant dense<0.000000e+00> : vector<16x128xf32>
    %2 = tpu.matmul %0, %1, %cst {dimension_numbers = #tpu.dot_dimension_numbers<[1], [0], [0], [1], [0, 0, 1, 1], [], []>} : vector<16x256xbf16>, vector<256x128xbf16>, vector<16x128xf32> -> vector<16x128xf32>
    %c0_3 = arith.constant 0 : index
    %c0_4 = arith.constant 0 : index
    %3 = vector.load %arg3[%c0_3, %c0_4] : memref<1x128xf32, #tpu.memory_space<vmem>>, vector<1x128xf32>
    %4 = vector.broadcast %3 : vector<1x128xf32> to vector<16x128xf32>
    %5 = arith.addf %2, %4 : vector<16x128xf32>
    %c0_5 = arith.constant 0 : index
    %c0_6 = arith.constant 0 : index
    %6 = vector.load %arg4[%c0_5, %c0_6] : memref<1x128xf32, #tpu.memory_space<vmem>>, vector<1x128xf32>
    %c0_7 = arith.constant 0 : index
    %c0_8 = arith.constant 0 : index
    %7 = vector.load %arg5[%c0_7, %c0_8] : memref<1x128xf32, #tpu.memory_space<vmem>>, vector<1x128xf32>
    %cst_9 = arith.constant dense<0.000000e+00> : vector<16xf32>
    %8 = vector.multi_reduction <add>, %5, %cst_9 [1] : vector<16x128xf32> to vector<16xf32>
    %9 = vector.shape_cast %8 : vector<16xf32> to vector<16x1xf32>
    %cst_10 = arith.constant 1.280000e+02 : f32
    %10 = vector.broadcast %cst_10 : f32 to vector<16x1xf32>
    %11 = arith.divf %9, %10 : vector<16x1xf32>
    %12 = vector.broadcast %11 : vector<16x1xf32> to vector<16x128xf32>
    %13 = arith.subf %5, %12 : vector<16x128xf32>
    %14 = arith.mulf %13, %13 : vector<16x128xf32>
    %cst_11 = arith.constant dense<0.000000e+00> : vector<16xf32>
    %15 = vector.multi_reduction <add>, %14, %cst_11 [1] : vector<16x128xf32> to vector<16xf32>
    %16 = vector.shape_cast %15 : vector<16xf32> to vector<16x1xf32>
    %cst_12 = arith.constant 1.280000e+02 : f32
    %17 = vector.broadcast %cst_12 : f32 to vector<16x1xf32>
    %18 = arith.divf %16, %17 : vector<16x1xf32>
    %19 = vector.broadcast %11 : vector<16x1xf32> to vector<16x128xf32>
    %20 = arith.subf %5, %19 : vector<16x128xf32>
    %cst_13 = arith.constant 9.99999997E-7 : f32
    %21 = vector.broadcast %cst_13 : f32 to vector<16x1xf32>
    %22 = arith.addf %18, %21 : vector<16x1xf32>
    %23 = math.rsqrt %22 : vector<16x1xf32>
    %24 = vector.broadcast %23 : vector<16x1xf32> to vector<16x128xf32>
    %25 = arith.mulf %20, %24 : vector<16x128xf32>
    %26 = vector.broadcast %6 : vector<1x128xf32> to vector<16x128xf32>
    %27 = arith.mulf %25, %26 : vector<16x128xf32>
    %28 = vector.broadcast %7 : vector<1x128xf32> to vector<16x128xf32>
    %29 = arith.addf %27, %28 : vector<16x128xf32>
    %cst_14 = arith.constant 0.000000e+00 : f32
    %30 = vector.broadcast %cst_14 : f32 to vector<16x128xf32>
    %31 = arith.maximumf %29, %30 : vector<16x128xf32>
    %32 = arith.truncf %31 : vector<16x128xf32> to vector<16x128xbf16>
    %c0_15 = arith.constant 0 : index
    %c0_16 = arith.constant 0 : index
    %33 = vector.load %arg6[%c0_15, %c0_16] : memref<128x128xbf16, #tpu.memory_space<vmem>>, vector<128x128xbf16>
    %cst_17 = arith.constant dense<0.000000e+00> : vector<16x128xf32>
    %34 = tpu.matmul %32, %33, %cst_17 {dimension_numbers = #tpu.dot_dimension_numbers<[1], [0], [0], [1], [0, 0, 1, 1], [], []>} : vector<16x128xbf16>, vector<128x128xbf16>, vector<16x128xf32> -> vector<16x128xf32>
    %c0_18 = arith.constant 0 : index
    %c0_19 = arith.constant 0 : index
    %35 = vector.load %arg7[%c0_18, %c0_19] : memref<1x128xf32, #tpu.memory_space<vmem>>, vector<1x128xf32>
    %36 = vector.broadcast %35 : vector<1x128xf32> to vector<16x128xf32>
    %37 = arith.addf %34, %36 : vector<16x128xf32>
    %c0_20 = arith.constant 0 : index
    %c0_21 = arith.constant 0 : index
    %38 = vector.load %arg8[%c0_20, %c0_21] : memref<1x128xf32, #tpu.memory_space<vmem>>, vector<1x128xf32>
    %c0_22 = arith.constant 0 : index
    %c0_23 = arith.constant 0 : index
    %39 = vector.load %arg9[%c0_22, %c0_23] : memref<1x128xf32, #tpu.memory_space<vmem>>, vector<1x128xf32>
    %cst_24 = arith.constant dense<0.000000e+00> : vector<16xf32>
    %40 = vector.multi_reduction <add>, %37, %cst_24 [1] : vector<16x128xf32> to vector<16xf32>
    %41 = vector.shape_cast %40 : vector<16xf32> to vector<16x1xf32>
    %cst_25 = arith.constant 1.280000e+02 : f32
    %42 = vector.broadcast %cst_25 : f32 to vector<16x1xf32>
    %43 = arith.divf %41, %42 : vector<16x1xf32>
    %44 = vector.broadcast %43 : vector<16x1xf32> to vector<16x128xf32>
    %45 = arith.subf %37, %44 : vector<16x128xf32>
    %46 = arith.mulf %45, %45 : vector<16x128xf32>
    %cst_26 = arith.constant dense<0.000000e+00> : vector<16xf32>
    %47 = vector.multi_reduction <add>, %46, %cst_26 [1] : vector<16x128xf32> to vector<16xf32>
    %48 = vector.shape_cast %47 : vector<16xf32> to vector<16x1xf32>
    %cst_27 = arith.constant 1.280000e+02 : f32
    %49 = vector.broadcast %cst_27 : f32 to vector<16x1xf32>
    %50 = arith.divf %48, %49 : vector<16x1xf32>
    %51 = vector.broadcast %43 : vector<16x1xf32> to vector<16x128xf32>
    %52 = arith.subf %37, %51 : vector<16x128xf32>
    %cst_28 = arith.constant 9.99999997E-7 : f32
    %53 = vector.broadcast %cst_28 : f32 to vector<16x1xf32>
    %54 = arith.addf %50, %53 : vector<16x1xf32>
    %55 = math.rsqrt %54 : vector<16x1xf32>
    %56 = vector.broadcast %55 : vector<16x1xf32> to vector<16x128xf32>
    %57 = arith.mulf %52, %56 : vector<16x128xf32>
    %58 = vector.broadcast %38 : vector<1x128xf32> to vector<16x128xf32>
    %59 = arith.mulf %57, %58 : vector<16x128xf32>
    %60 = vector.broadcast %39 : vector<1x128xf32> to vector<16x128xf32>
    %61 = arith.addf %59, %60 : vector<16x128xf32>
    %cst_29 = arith.constant 0.000000e+00 : f32
    %62 = vector.broadcast %cst_29 : f32 to vector<16x128xf32>
    %63 = arith.maximumf %61, %62 : vector<16x128xf32>
    %64 = arith.truncf %63 : vector<16x128xf32> to vector<16x128xbf16>
    %c0_30 = arith.constant 0 : index
    %c0_31 = arith.constant 0 : index
    %65 = vector.load %arg10[%c0_30, %c0_31] : memref<128x128xbf16, #tpu.memory_space<vmem>>, vector<128x128xbf16>
    %cst_32 = arith.constant dense<0.000000e+00> : vector<16x128xf32>
    %66 = tpu.matmul %64, %65, %cst_32 {dimension_numbers = #tpu.dot_dimension_numbers<[1], [0], [0], [1], [0, 0, 1, 1], [], []>} : vector<16x128xbf16>, vector<128x128xbf16>, vector<16x128xf32> -> vector<16x128xf32>
    %c0_33 = arith.constant 0 : index
    %c0_34 = arith.constant 0 : index
    %67 = vector.load %arg11[%c0_33, %c0_34] : memref<1x128xf32, #tpu.memory_space<vmem>>, vector<1x128xf32>
    %68 = vector.broadcast %67 : vector<1x128xf32> to vector<16x128xf32>
    %69 = arith.addf %66, %68 : vector<16x128xf32>
    %c0_35 = arith.constant 0 : index
    %c0_36 = arith.constant 0 : index
    %70 = vector.load %arg12[%c0_35, %c0_36] : memref<16x128xf32, #tpu.memory_space<vmem>>, vector<16x128xf32>
    tpu.vector_store %arg12[%c0_35, %c0_36], %69 {strides = array<i32>} : memref<16x128xf32, #tpu.memory_space<vmem>>, vector<16x128xf32>,
    %cst_37 = arith.constant dense<0.000000e+00> : vector<128xf32>
    %71 = vector.multi_reduction <add>, %69, %cst_37 [0] : vector<16x128xf32> to vector<128xf32>
    %72 = vector.shape_cast %71 : vector<128xf32> to vector<1x128xf32>
    %73 = arith.mulf %69, %69 : vector<16x128xf32>
    %cst_38 = arith.constant dense<0.000000e+00> : vector<128xf32>
    %74 = vector.multi_reduction <add>, %73, %cst_38 [0] : vector<16x128xf32> to vector<128xf32>
    %75 = vector.shape_cast %74 : vector<128xf32> to vector<1x128xf32>
    %cst_39 = arith.constant dense<0.000000e+00> : vector<16xf32>
    %76 = vector.multi_reduction <add>, %69, %cst_39 [1] : vector<16x128xf32> to vector<16xf32>
    %77 = vector.shape_cast %76 : vector<16xf32> to vector<16x1xf32>
    %cst_40 = arith.constant 1.280000e+02 : f32
    %78 = vector.broadcast %cst_40 : f32 to vector<16x1xf32>
    %79 = arith.divf %77, %78 : vector<16x1xf32>
    %80 = vector.broadcast %79 : vector<16x1xf32> to vector<16x128xf32>
    %81 = arith.subf %69, %80 : vector<16x128xf32>
    %82 = arith.mulf %81, %81 : vector<16x128xf32>
    %cst_41 = arith.constant dense<0.000000e+00> : vector<16xf32>
    %83 = vector.multi_reduction <add>, %82, %cst_41 [1] : vector<16x128xf32> to vector<16xf32>
    %84 = vector.shape_cast %83 : vector<16xf32> to vector<16x1xf32>
    %cst_42 = arith.constant 1.280000e+02 : f32
    %85 = vector.broadcast %cst_42 : f32 to vector<16x1xf32>
    %86 = arith.divf %84, %85 : vector<16x1xf32>
    %87 = math.sqrt %86 : vector<16x1xf32>
    %88 = vector.shape_cast %87 : vector<16x1xf32> to vector<1x16x1xf32>
    %cst_43 = arith.constant dense<0.000000e+00> : vector<1xf32>
    %89 = vector.multi_reduction <add>, %88, %cst_43 [1, 2] : vector<1x16x1xf32> to vector<1xf32>
    %90 = vector.shape_cast %89 : vector<1xf32> to vector<1x1x1xf32>
    %91 = vector.extract %90[0, 0, 0] : f32 from vector<1x1x1xf32>
    %92 = vector.broadcast %91 : f32 to vector<1x128xf32>
    %cst_44 = arith.constant 0.000000e+00 : f32
    %93 = vector.broadcast %cst_44 : f32 to vector<5x128xf32>
    %94 = tpu.concatenate %72, %75, %92, %93 in 0 : vector<1x128xf32>, vector<1x128xf32>, vector<1x128xf32>, vector<5x128xf32> -> vector<8x128xf32>
    %c0_45 = arith.constant 0 : index
    %c0_46 = arith.constant 0 : index
    %c0_47 = arith.constant 0 : index
    %95 = vector.load %arg13[%c0_45, %c0_46, %c0_47] : memref<1x8x128xf32, #tpu.memory_space<vmem>>, vector<1x8x128xf32>
    %96 = vector.shape_cast %95 : vector<1x8x128xf32> to vector<8x128xf32>
    %97 = vector.shape_cast %94 : vector<8x128xf32> to vector<1x8x128xf32>
    tpu.vector_store %arg13[%c0_45, %c0_46, %c0_47], %97 {strides = array<i32>} : memref<1x8x128xf32, #tpu.memory_space<vmem>>, vector<1x8x128xf32>,
    return
  }
  func.func @transform_0(%arg0: i32) -> (i32, i32) {
    %c0_i32 = arith.constant 0 : i32
    %c0_i32_0 = arith.constant 0 : i32
    return %arg0, %c0_i32 : i32, i32
  }
  func.func @transform_1(%arg0: i32) -> (i32, i32) {
    %c0_i32 = arith.constant 0 : i32
    %c0_i32_0 = arith.constant 0 : i32
    %c0_i32_1 = arith.constant 0 : i32
    return %c0_i32, %c0_i32_0 : i32, i32
  }
  func.func @transform_2(%arg0: i32) -> (i32, i32) {
    %c0_i32 = arith.constant 0 : i32
    %c0_i32_0 = arith.constant 0 : i32
    %c0_i32_1 = arith.constant 0 : i32
    return %c0_i32, %c0_i32_0 : i32, i32
  }
  func.func @transform_3(%arg0: i32) -> (i32, i32) {
    %c0_i32 = arith.constant 0 : i32
    %c0_i32_0 = arith.constant 0 : i32
    %c0_i32_1 = arith.constant 0 : i32
    return %c0_i32, %c0_i32_0 : i32, i32
  }
  func.func @transform_4(%arg0: i32) -> (i32, i32) {
    %c0_i32 = arith.constant 0 : i32
    %c0_i32_0 = arith.constant 0 : i32
    %c0_i32_1 = arith.constant 0 : i32
    return %c0_i32, %c0_i32_0 : i32, i32
  }
  func.func @transform_5(%arg0: i32) -> (i32, i32) {
    %c0_i32 = arith.constant 0 : i32
    %c0_i32_0 = arith.constant 0 : i32
    %c0_i32_1 = arith.constant 0 : i32
    return %c0_i32, %c0_i32_0 : i32, i32
  }
  func.func @transform_6(%arg0: i32) -> (i32, i32) {
    %c0_i32 = arith.constant 0 : i32
    %c0_i32_0 = arith.constant 0 : i32
    %c0_i32_1 = arith.constant 0 : i32
    return %c0_i32, %c0_i32_0 : i32, i32
  }
  func.func @transform_7(%arg0: i32) -> (i32, i32) {
    %c0_i32 = arith.constant 0 : i32
    %c0_i32_0 = arith.constant 0 : i32
    %c0_i32_1 = arith.constant 0 : i32
    return %c0_i32, %c0_i32_0 : i32, i32
  }
  func.func @transform_8(%arg0: i32) -> (i32, i32) {
    %c0_i32 = arith.constant 0 : i32
    %c0_i32_0 = arith.constant 0 : i32
    %c0_i32_1 = arith.constant 0 : i32
    return %c0_i32, %c0_i32_0 : i32, i32
  }
  func.func @transform_9(%arg0: i32) -> (i32, i32) {
    %c0_i32 = arith.constant 0 : i32
    %c0_i32_0 = arith.constant 0 : i32
    %c0_i32_1 = arith.constant 0 : i32
    return %c0_i32, %c0_i32_0 : i32, i32
  }
  func.func @transform_10(%arg0: i32) -> (i32, i32) {
    %c0_i32 = arith.constant 0 : i32
    %c0_i32_0 = arith.constant 0 : i32
    %c0_i32_1 = arith.constant 0 : i32
    return %c0_i32, %c0_i32_0 : i32, i32
  }
  func.func @transform_11(%arg0: i32) -> (i32, i32) {
    %c0_i32 = arith.constant 0 : i32
    %c0_i32_0 = arith.constant 0 : i32
    return %arg0, %c0_i32 : i32, i32
  }
  func.func @transform_12(%arg0: i32) -> (i32, i32, i32) {
    %c0_i32 = arith.constant 0 : i32
    %c0_i32_0 = arith.constant 0 : i32
    %c0_i32_1 = arith.constant 0 : i32
    return %arg0, %c0_i32, %c0_i32_0 : i32, i32, i32
  }
}

</mosaic_0001>

<bundles_post_ra>
// kernel: projection_head_forward.1
= control target key start
LH: loop header
LB: loop body
LE: loop exit
PB: predicated region body
PF: predicated region fallthrough
CT: control target
= control target key end

     0   :  { %18 = vsyncpa [#allocation3], 0  ;;  %s1732_s0 = inlined_call_operand.vmem [shape: bf16[64,256], index: 0, kind: input, shape index: {}]   ;;  %s1733_s1 = inlined_call_operand.vmem [shape: bf16[256,128], index: 1, kind: input, shape index: {}]   ;;  %s1734_s2 = inlined_call_operand.vmem [shape: f32[1,128], index: 2, kind: input, shape index: {}]   ;;  %s1735_s3 = inlined_call_operand.vmem [shape: f32[1,128], index: 3, kind: input, shape index: {}]   ;;  %s1736_s4 = inlined_call_operand.vmem [shape: f32[1,128], index: 4, kind: input, shape index: {}]   ;;  %s1737_s5 = inlined_call_operand.vmem [shape: bf16[128,128], index: 5, kind: input, shape index: {}]   ;;  %s1738_s6 = inlined_call_operand.vmem [shape: f32[1,128], index: 6, kind: input, shape index: {}]   ;;  %s1739_s7 = inlined_call_operand.vmem [shape: f32[1,128], index: 7, kind: input, shape index: {}]   ;;  %s1740_s8 = inlined_call_operand.vmem [shape: f32[1,128], index: 8, kind: input, shape index: {}]   ;;  %s1741_s9 = inlined_call_operand.vmem [shape: bf16[128,128], index: 9, kind: input, shape index: {}]   ;;  %s1742_s10 = inlined_call_operand.vmem [shape: f32[1,128], index: 10, kind: input, shape index: {}]   ;;  %s1743_s11 = inlined_call_operand.hbm [shape: f32[64,128], index: 11, kind: output, shape index: {0}]   ;;  %s1744_s12 = inlined_call_operand.vmem [shape: f32[4,8,128], index: 12, kind: output, shape index: {1}]  }
   0x1   :  { %20 = vsyncpa [#allocation3 + $0x1], 0  ;;  %s1466_s21 = smov 0   ;;  %s1468_s22 = smov 0  }
   0x2   :  { %s1470_s23 = smov 0   ;;  %s1472_s24 = smov 0  }
   0x3 LB: > { %1749 = sst [smem:[#allocation5_spill]] %s1390_s23  ;;  %s1487_s25 = sadd.s32 4294967295, %s1394_s24   ;;  %s1394_s24 = sphi %s1472_s24, %s1756_s24   ;;  %s1390_s23 = sphi %s1470_s23, %s1758_s23   ;;  %s1386_s22 = sphi %s1468_s22, %s1760_s22   ;;  %s1382_s21 = sphi %s1466_s21, %s1759_s21  }
   0x4   : > { %s1105_s26 = sadd.s32 4294967294, %s1394_s24   ;;  %s1491_s27 = sadd.s32 1, %s1394_s24  }
   0x5   : > { %1750 = sst [smem:[#allocation6_spill]] %s1491_s27  ;;  %s269_s28 = sadd.s32 1, %s1390_s23 }
   0x6   : > { %s266_s29 = ssub.s32 %s1394_s24, %s1491_s27  ;;  %p279_p0 = scmp.ne.s32.totalorder %s1390_s23, %s1386_s22 }
   0x7   : > { %p267_p1 = scmp.eq.s32.totalorder %s266_s29, 0  ;;  %p280_p2 = scmp.eq.s32.totalorder %s1487_s25, 3 }
   0x8   : > { %p285_p3 = scmp.ne.s32.totalorder %s1386_s22, %s1382_s21  ;;  %p286_p4 = scmp.eq.s32.totalorder %s1105_s26, 3 }
   0x9   : > { %s1502_s30 = scalar_select %p267_p1, %s1390_s23, %s269_s28  }
   0xa   : > { %p1504_p5 = por %p280_p2, %p279_p0  ;;  %p1508_p6 = por %p286_p4, %p285_p3 }
   0xb   : > { %1751 = sst [smem:[#allocation7_spill]] %s1502_s30  ;;  %p1108_p7 = scmp.ge.s32.totalorder %s1394_s24, 1 }
   0xc   : > { %s1753_s14 = scalar_select %p1508_p6, 1, 0 }
   0xd   : > { %p370_p8 = scmp.lt.s32.totalorder %s1394_s24, 5 }
   0xe   : > { %1754 = sst [smem:[#allocation8_spill]] %s1753_s14 }
   0xf   : > { %p371_p9 = pnand %p1108_p7, %p370_p8 }
  0x10   : > { %s1110_s17 = sshll.u32 (!%p371_p9), %s1487_s25, 1  ;;  %s408_s28 = sand.u32 (!%p371_p9), 1, %s1386_s22  }
  0x11   : > { %374 = sbr.rel (%p371_p9) target bundleno = 1785 (0x6f9), region = 64  ;;  %p418_p10 = scmp.lt.s32.totalorder (!%p371_p9), %s1110_s17, 7 }
  0x12   : > { %s1109_s15 = sshll.u32 (!%p371_p9), %s408_s28, 4  ;;  %s1398_s26 = smov (!%p371_p9), [#allocation2]  }
  0x13   : > { %s1659_s14 = scalar_lea.vmem (!%p371_p9), [#allocation2], %s1109_s15  ;;  %s1338_s15 = sshll.u32 (!%p371_p9), %s1398_s26, 4  ;;  %s1339_s15 = int_to_ptr.vmem [resolvable:$false] %s1338_s15 }
  0x14   : > { %s1016_s16 = sshll.u32 (!%p371_p9), %s1659_s14, 4  ;;  %s1340_s23 = scalar_lea.vmem (!%p371_p9), %s1339_s15, 512  ;;  %s1677_s16 = int_to_ptr.vmem [resolvable:$true] %s1016_s16 }
  0x15   : > { %p1341_p0 = scmp.lt.s32.totalorder (!%p371_p9), %s1677_s16, %s1339_s15 }
  0x16   : > { %v1287_v0 = vld [vmem:[%s1733_s1 + $0x78] sm:$0xff]   ;;  %v1289_v2 = vld [vmem:[%s1733_s1 + $0x70] sm:$0xff]   ;;  %v1291_v4 = vld [vmem:[%s1733_s1 + $0x68] sm:$0xff]   ;;  %s1762_s17 = smov (!%p418_p10, %s1110_s17), 7  ;;  %v1396_v36 = vmov 0.0   ;;  %vm1397_vm0 = vmmov 0  }
  0x17   : > { %v1288_v1 = vld [vmem:[%s1733_s1 + $0x38] sm:$0xff]   ;;  %1162 = vmatprep.subr.bf16.mxu0 %v1287_v0  ;;  %v1290_v3 = vld [vmem:[%s1733_s1 + $0x30] sm:$0xff]   ;;  %v1292_v5 = vld [vmem:[%s1733_s1 + $0x28] sm:$0xff]   ;;  %s1160_s29 = sshll.u32 %s1762_s17, 3  ;;  %1202 = vmatprep.subr.bf16.mxu1 %v1396_v36  ;;  %vm977_vm4 = vcmask 7168   ;;  %s1334_s17 = scalar_lea.vmem %s1677_s16, 256 }
  0x18   : > { %1163 = vmatpush3.bf16.msra.mxu0 %v1288_v1  ;;  %v1293_v6 = vld [vmem:[%s1733_s1 + $0x60] sm:$0xff]   ;;  %v1295_v8 = vld [vmem:[%s1733_s1 + $0x58] sm:$0xff]   ;;  %s422_s18 = scalar_lea.vmem %s1732_s0, %s1160_s29  ;;  %v1297_v10 = vld [vmem:[%s1733_s1 + $0x50] sm:$0xff]   ;;  %1218 = vmatprep.mubr.msk.bf16.mxu1 %vm1397_vm0, %v1396_v36  ;;  %s1161_s29 = sshll.u32 %s1487_s25, 8 }
  0x19   : > { %1164 = vmatprep.subr.bf16.mxu0 %v1289_v2  ;;  %v1294_v7 = vld [vmem:[%s1733_s1 + $0x20] sm:$0xff]   ;;  %v1296_v9 = vld [vmem:[%s1733_s1 + $0x18] sm:$0xff]   ;;  %v1298_v11 = vld [vmem:[%s1733_s1 + $0x10] sm:$0xff]   ;;  %s1675_s20 = scalar_lea.hbm %s1743_s11, %s1161_s29  ;;  %p1335_p11 = scmp.ne.s32.totalorder %s1677_s16, %s1334_s17 }
  0x1a   : > { %v1305_v12 = vld [vmem:[%s422_s18 + $0x4] ss:$8 sps:$4 sm:$0xff]   ;;  %v1303_v17 = vld [vmem:[%s422_s18] ss:$8 sps:$4 sm:$0xff]   ;;  %v1306_v35 = vld [vmem:[%s1737_s5 + $0x38] sm:$0xff]   ;;  %s1681_s18 = scalar_lea.sflag [#allocation3], %s408_s28  ;;  %p1342_p1 = scmp.lt.s32.totalorder %s1340_s23, %s1334_s17 }
  0x1b   : > { %v1299_v13 = vld [vmem:[%s1733_s1 + $0x48] sm:$0xff]   ;;  %609 = vmatprep.mubr.bf16.mxu0 %v1305_v12  ;;  %v1301_v15 = vld [vmem:[%s1733_s1 + $0x40] sm:$0xff]   ;;  %1203 = vmatpush3.bf16.msra.mxu1 %v1306_v35  ;;  %v1307_v37 = vld [vmem:[%s1737_s5 + $0x30] sm:$0xff]   ;;  %p1336_p12 = pnand %p1335_p11, %p1504_p5 }
  0x1c   : > { %1165 = vmatpush3.bf16.msra.mxu0 %v1290_v3  ;;  %v1300_v14 = vld [vmem:[%s1733_s1 + $0x8] sm:$0xff]   ;;  %v1302_v16 = vld [vmem:[%s1733_s1] sm:$0xff]   ;;  %1204 = vmatprep.subr.bf16.mxu1 %v1396_v36  ;;  %v1310_v40 = vld [vmem:[%s1737_s5 + $0x18] sm:$0xff]   ;;  %p1343_p2 = por %p1342_p1, %p1341_p0 }
  0x1d   : > { %1166 = vmatprep.subr.bf16.mxu0 %v1291_v4  ;;  %v1114_v20 = vld [vmem:[%s1734_s2] ss:$0 sm:$0xff]  ;;  %v1308_v38 = vld [vmem:[%s1737_s5 + $0x28] sm:$0xff]   ;;  %v1311_v41 = vld [vmem:[%s1737_s5 + $0x10] sm:$0xff]   ;;  %p1337_p13 = pneg %p1336_p12 }
  0x1e   : > { %v1309_v39 = vld [vmem:[%s1737_s5 + $0x20] sm:$0xff]   ;;  %v1312_v42 = vld [vmem:[%s1737_s5 + $0x8] sm:$0xff]  }
  0x1f   : > { %1205 = vmatpush3.bf16.msra.mxu1 %v1307_v37  ;;  %v1313_v43 = vld [vmem:[%s1737_s5] sm:$0xff]   ;;  %p1344_p3 = pnand %p1343_p2, %p1337_p13 }
  0x20   : > { %1167 = vmatpush3.bf16.msra.mxu0 %v1292_v5  ;;  %1206 = vmatprep.subr.bf16.mxu1 %v1396_v36  ;;  %v1133_v51 = vld [vmem:[%s1735_s3] ss:$0 sm:$0xff] }
  0x21   : > { %1168 = vmatprep.subr.bf16.mxu0 %v1293_v6  ;;  %v1134_v55 = vld [vmem:[%s1736_s4] ss:$0 sm:$0xff] }
  0x22   : > { %v1135_v63 = vld [vmem:[%s1738_s6] ss:$0 sm:$0xff] }
  0x23   : > { %1207 = vmatpush3.bf16.msra.mxu1 %v1308_v38 }
  0x24   : > { %1169 = vmatpush3.bf16.msra.mxu0 %v1294_v7  ;;  %1208 = vmatprep.subr.bf16.mxu1 %v1396_v36 }
  0x25   : > { %1170 = vmatprep.subr.bf16.mxu0 %v1295_v8 }
  0x27   : > { %1209 = vmatpush3.bf16.msra.mxu1 %v1309_v39 }
  0x28   : > { %1171 = vmatpush3.bf16.msra.mxu0 %v1296_v9  ;;  %1210 = vmatprep.subr.bf16.mxu1 %v1396_v36 }
  0x29   : > { %1172 = vmatprep.subr.bf16.mxu0 %v1297_v10 }
  0x2b   : > { %1211 = vmatpush3.bf16.msra.mxu1 %v1310_v40 }
  0x2c   : > { %1173 = vmatpush3.bf16.msra.mxu0 %v1298_v11  ;;  %1212 = vmatprep.subr.bf16.mxu1 %v1396_v36 }
  0x2d   : > { %1174 = vmatprep.subr.bf16.mxu0 %v1299_v13 }
  0x2f   : > { %1213 = vmatpush3.bf16.msra.mxu1 %v1311_v41  ;;  %v1146_v41 = vld [vmem:[%s1742_s10] ss:$0 sm:$0xff] }
  0x30   : > { %1175 = vmatpush3.bf16.msra.mxu0 %v1300_v14  ;;  %1214 = vmatprep.subr.bf16.mxu1 %v1396_v36  ;;  %v1314_v14 = vld [vmem:[%s1741_s9 + $0x38] sm:$0xff]  }
  0x31   : > { %1176 = vmatprep.subr.bf16.mxu0 %v1301_v15  ;;  %v1315_v15 = vld [vmem:[%s1741_s9 + $0x30] sm:$0xff]  }
  0x33   : > { %1215 = vmatpush3.bf16.msra.mxu1 %v1312_v42 }
  0x34   : > { %1177 = vmatpush3.bf16.msra.mxu0 %v1302_v16  ;;  %1216 = vmatprep.subr.bf16.mxu1 %v1396_v36  ;;  %v1316_v16 = vld [vmem:[%s1741_s9 + $0x28] sm:$0xff]  }
  0x35   : > { %1222 = vmatprep.subr.bf16.mxu0 %v1396_v36 }
  0x37   : > { %610 = vmatmul.mubr.bf16.vlgmr.msra.gmra.mxu0 %v1303_v17  ;;  %1217 = vmatpush3.bf16.msra.mxu1 %v1313_v43  ;;  %v1317_v17 = vld [vmem:[%s1741_s9 + $0x20] sm:$0xff]  }
  0x38   : > { %1238 = vmatprep.mubr.msk.bf16.mxu0 %vm1397_vm0, %v1396_v36  ;;  %1223 = vmatpush3.bf16.msra.mxu0 %v1314_v14 }
  0x39   : > { %1224 = vmatprep.subr.bf16.mxu0 %v1396_v36 }
  0x3c   : > { %1225 = vmatpush3.bf16.msra.mxu0 %v1315_v15 }
  0x3d   : > { %1226 = vmatprep.subr.bf16.mxu0 %v1396_v36 }
  0x40   : > { %1227 = vmatpush3.bf16.msra.mxu0 %v1316_v16 }
  0x41   : > { %1228 = vmatprep.subr.bf16.mxu0 %v1396_v36 }
  0x44   : > { %1229 = vmatpush3.bf16.msra.mxu0 %v1317_v17 }
  0x45   : > { %1230 = vmatprep.subr.bf16.mxu0 %v1396_v36 }
  0xf7   : > { %v1178_v18 = vpop.f32.mrf.mxu0 }
  0xf9   : > { %v1179_v19 = vpop.f32.mrf.mxu0 }
  0xfa   : > { %v1180_v21 = vadd.f32 %v1179_v19, %v1178_v18  ;;  %v1318_v18 = vld [vmem:[%s1741_s9 + $0x18] sm:$0xff]   ;;  %v1319_v19 = vld [vmem:[%s1741_s9 + $0x10] sm:$0xff]  }
  0xfb   : > { %v1181_v22 = vpop.f32.mrf.mxu0  ;;  %1231 = vmatpush3.bf16.msra.mxu0 %v1318_v18 }
  0xfc   : > { %v612_v23 = vadd.f32 %v1180_v21, %v1114_v20  ;;  %1232 = vmatprep.subr.bf16.mxu0 %v1396_v36  ;;  %v1321_v21 = vld [vmem:[%s1741_s9] sm:$0xff]  }
  0xfd   : > { %v1182_v24 = vpop.f32.mrf.mxu0 }
  0xfe   : > { %v1183_v25 = vadd.f32 %v1182_v24, %v1181_v22  ;;  %620 = vadd.xlane.f32.xlu0 %v612_v23 }
  0xff   : > { %1233 = vmatpush3.bf16.msra.mxu0 %v1319_v19 }
 0x100   : > { %v615_v26 = vadd.f32 %v1183_v25, %v1114_v20  ;;  %v1320_v20 = vld [vmem:[%s1741_s9 + $0x8] sm:$0xff]   ;;  %1234 = vmatprep.subr.bf16.mxu0 %v1396_v36 }
 0x102   : > { %622 = vadd.xlane.f32.xlu0 %v615_v26 }
 0x103   : > { %1235 = vmatpush3.bf16.msra.mxu0 %v1320_v20 }
 0x104   : > { %1236 = vmatprep.subr.bf16.mxu0 %v1396_v36 }
 0x107   : > { %1237 = vmatpush3.bf16.msra.mxu0 %v1321_v21 }
 0x187   : > { %v621_v27 = vpop.xlane.xlu0 %620 }
 0x188   : > { %v625_v28 = vmul.f32 0.0078125, %v621_v27 }
 0x18a   : > { %v627_v29 = vsub.f32 %v612_v23, %v625_v28 }
 0x18b   : > { %v623_v30 = vpop.xlane.xlu0 %622 }
 0x18c   : > { %v626_v31 = vmul.f32 0.0078125, %v623_v30  ;;  %v629_v32 = vmul.f32 %v627_v29, %v627_v29 }
 0x18e   : > { %v628_v33 = vsub.f32 %v615_v26, %v626_v31  ;;  %631 = vadd.xlane.f32.xlu1 %v629_v32 }
 0x190   : > { %v630_v34 = vmul.f32 %v628_v33, %v628_v33 }
 0x192   : > { %633 = vadd.xlane.f32.xlu1 %v630_v34 }
 0x217   : > { %v632_v44 = vpop.xlane.xlu1 %631 }
 0x218   : > { %v635_v45 = vmul.f32 0.0078125, %v632_v44 }
 0x21a   : > { %v637_v46 = vadd.f32 1e-06, %v635_v45 }
 0x21b   : > { %v634_v47 = vpop.xlane.xlu1 %633 }
 0x21c   : > { %1322 = vrsqrt.f32 %v637_v46  ;;  %v636_v48 = vmul.f32 0.0078125, %v634_v47 }
 0x21e   : > { %v638_v49 = vadd.f32 1e-06, %v636_v48 }
 0x220   : > { %1324 = vrsqrt.f32 %v638_v49 }
 0x229   : > { %v1323_v50 = vpop.eup %1322 }
 0x22a   : > { %v641_v52 = vmul.f32 %v1323_v50, %v627_v29  ;;  %v1144_v29 = vld [vmem:[%s1739_s7] ss:$0 sm:$0xff] }
 0x22c   : > { %v649_v53 = vmul.f32 %v1133_v51, %v641_v52 }
 0x22d   : > { %v1325_v54 = vpop.eup %1324 }
 0x22e   : > { %v642_v56 = vmul.f32 %v1325_v54, %v628_v33  ;;  %v657_v58 = vadd.f32 %v1134_v55, %v649_v53  ;;  %v1145_v33 = vld [vmem:[%s1740_s8] ss:$0 sm:$0xff] }
 0x230   : > { %v650_v57 = vmul.f32 %v1133_v51, %v642_v56  ;;  %v659_v60 = vmax.f32 %v657_v58, 0.0 }
 0x232   : > { %v658_v59 = vadd.f32 %v1134_v55, %v650_v57 }
 0x234   : > { %v660_v61 = vmax.f32 %v658_v59, 0.0 }
 0x236   : > { %v661_v62 = vpack.c.bf16 %v660_v61, %v659_v60 }
 0x238   : > { %1219 = vmatmul.mubr.bf16.vlgmr.msra.gmra.mxu1 %v661_v62 }
 0x2f8   : > { %v767_v0 = vpop.f32.mrf.mxu1 }
 0x2f9   : > { %v768_v1 = vadd.f32 %v1135_v63, %v767_v0 }
 0x2fa   : > { %v1220_v2 = vpop.f32.mrf.mxu1 }
 0x2fb   : > { %776 = vadd.xlane.f32.xlu0 %v768_v1 }
 0x2fc   : > { %v770_v3 = vpop.f32.mrf.mxu1 }
 0x2fd   : > { %v771_v4 = vadd.f32 %v1135_v63, %v770_v3 }
 0x2fe   : > { %v1221_v5 = vpop.f32.mrf.mxu1 }
 0x2ff   : > { %778 = vadd.xlane.f32.xlu1 %v771_v4 }
 0x384   : > { %v777_v6 = vpop.xlane.xlu0 %776 }
 0x385   : > { %v780_v7 = vmul.f32 0.0078125, %v777_v6 }
 0x387   : > { %v782_v8 = vsub.f32 %v768_v1, %v780_v7 }
 0x388   : > { %v779_v9 = vpop.xlane.xlu1 %778 }
 0x389   : > { %v781_v10 = vmul.f32 0.0078125, %v779_v9  ;;  %v784_v11 = vmul.f32 %v782_v8, %v782_v8 }
 0x38b   : > { %v783_v12 = vsub.f32 %v771_v4, %v781_v10  ;;  %786 = vadd.xlane.f32.xlu0 %v784_v11 }
 0x38d   : > { %v785_v13 = vmul.f32 %v783_v12, %v783_v12 }
 0x38f   : > { %788 = vadd.xlane.f32.xlu1 %v785_v13 }
 0x414   : > { %v787_v22 = vpop.xlane.xlu0 %786 }
 0x415   : > { %v790_v23 = vmul.f32 0.0078125, %v787_v22 }
 0x417   : > { %v792_v24 = vadd.f32 1e-06, %v790_v23 }
 0x418   : > { %v789_v25 = vpop.xlane.xlu1 %788 }
 0x419   : > { %1326 = vrsqrt.f32 %v792_v24  ;;  %v791_v26 = vmul.f32 0.0078125, %v789_v25 }
 0x41b   : > { %v793_v27 = vadd.f32 1e-06, %v791_v26 }
 0x41d   : > { %1328 = vrsqrt.f32 %v793_v27 }
 0x426   : > { %v1327_v28 = vpop.eup %1326 }
 0x427   : > { %v796_v30 = vmul.f32 %v1327_v28, %v782_v8 }
 0x429   : > { %v804_v31 = vmul.f32 %v1144_v29, %v796_v30 }
 0x42a   : > { %v1329_v32 = vpop.eup %1328 }
 0x42b   : > { %v797_v34 = vmul.f32 %v1329_v32, %v783_v12  ;;  %v812_v36 = vadd.f32 %v1145_v33, %v804_v31 }
 0x42d   : > { %v805_v35 = vmul.f32 %v1144_v29, %v797_v34  ;;  %v814_v38 = vmax.f32 %v812_v36, 0.0 }
 0x42f   : > { %v813_v37 = vadd.f32 %v1145_v33, %v805_v35 }
 0x431   : > { %v815_v39 = vmax.f32 %v813_v37, 0.0 }
 0x433   : > { %v816_v40 = vpack.c.bf16 %v815_v39, %v814_v38 }
 0x435   : > { %1239 = vmatmul.mubr.bf16.vlgmr.msra.gmra.mxu0 %v816_v40 }
 0x4f5   : > { %v922_v42 = vpop.f32.mrf.mxu0 }
 0x4f6   : > { %v1656_v43 = vadd.f32 %v1146_v41, %v922_v42 }
 0x4f7   : > { %v1240_v44 = vpop.f32.mrf.mxu0 }
 0x4f8   : > { %947 = vadd.xlane.f32.xlu0 %v1656_v43  ;;  %929 = vst [vmem:[%s1659_s14] sm:$0xff] %v1656_v43 }
 0x4f9   : > { %v925_v45 = vpop.f32.mrf.mxu0 }
 0x4fa   : > { %v1663_v46 = vadd.f32 %v1146_v41, %v925_v45 }
 0x4fb   : > { %v1241_v47 = vpop.f32.mrf.mxu0 }
 0x4fc   : > { %949 = vadd.xlane.f32.xlu1 %v1663_v46  ;;  %930 = vst [vmem:[%s1659_s14 + $0x8] sm:$0xff] %v1663_v46 }
 0x581   : > { %v948_v48 = vpop.xlane.xlu0 %947 }
 0x582   : > { %v951_v49 = vmul.f32 0.0078125, %v948_v48 }
 0x584   : > { %v953_v50 = vsub.f32 %v1656_v43, %v951_v49 }
 0x585   : > { %v950_v51 = vpop.xlane.xlu1 %949 }
 0x586   : > { %v952_v52 = vmul.f32 0.0078125, %v950_v51  ;;  %v955_v53 = vmul.f32 %v953_v50, %v953_v50 }
 0x588   : > { %957 = vadd.xlane.f32.xlu0 %v955_v53  ;;  %v954_v54 = vsub.f32 %v1663_v46, %v952_v52 }
 0x58a   : > { %v956_v55 = vmul.f32 %v954_v54, %v954_v54 }
 0x58c   : > { %959 = vadd.xlane.f32.xlu1 %v956_v55 }
 0x611   : > { %v958_v56 = vpop.xlane.xlu0 %957 }
 0x612   : > { %v961_v57 = vmul.f32 0.0078125, %v958_v56 }
 0x614   : > { %1330 = vrsqrt.f32 %v961_v57  ;;  %vm965_vm1 = vcmp.eq.f32.partialorder %v961_v57, inf  ;;  %v968_v0 = vand.u32 2147483648, %v961_v57  ;;  %vm967_vm2 = vcmp.eq.f32.partialorder %v961_v57, 0.0 }
 0x615   : > { %v960_v58 = vpop.xlane.xlu1 %959 }
 0x616   : > { %v962_v59 = vmul.f32 0.0078125, %v960_v58 }
 0x618   : > { %1332 = vrsqrt.f32 %v962_v59  ;;  %vm972_vm3 = vcmp.eq.f32.partialorder %v962_v59, inf  ;;  %v975_v3 = vand.u32 2147483648, %v962_v59  ;;  %vm974_vm5 = vcmp.eq.f32.partialorder %v962_v59, 0.0 }
 0x621   : > { %v1331_v60 = vpop.eup %1330 }
 0x622   : > { %v964_v61 = vmul.f32 %v1331_v60, %v961_v57 }
 0x624   : > { %v966_v62 = vsel %vm965_vm1, %v961_v57, %v964_v61 }
 0x625   : > { %v1333_v63 = vpop.eup %1332  ;;  %v969_v2 = vsel %vm967_vm2, %v968_v0, %v966_v62 }
 0x626   : > { %v971_v1 = vmul.f32 %v1333_v63, %v962_v59  ;;  %v978_v6 = vsel %vm977_vm4, %v969_v2, 0.0 }
 0x628   : > { %v973_v4 = vsel %vm972_vm3, %v962_v59, %v971_v1 }
 0x629   : > { %v976_v5 = vsel %vm974_vm5, %v975_v3, %v973_v4 }
 0x62a   : > { %v979_v7 = vsel %vm977_vm4, %v976_v5, 0.0 }
 0x62b   : > { %v980_v8 = vadd.f32 %v979_v7, %v978_v6 }
 0x62d   : > { %981 = vadd.xlane.f32.xlu0 %v980_v8 }
 0x62e   : > { %1347 = shalt.err (!%p1344_p3)
}
 0x62f   : > { %s1348_s28 = scalar_lea.hbm %s1675_s20, 256  ;;  %s1352_s29 = scalar_lea.hbm %s1743_s11, 1024 }
 0x630   : > { %p1349_p4 = scmp.ne.s32.totalorder %s1675_s20, %s1348_s28  ;;  %p1353_p9 = scmp.lt.s32.totalorder %s1675_s20, %s1743_s11 }
 0x631   : > { %p1354_p10 = scmp.lt.s32.totalorder %s1352_s29, %s1348_s28 }
 0x632   : > { %p1350_p7 = pnand %p1349_p4, %p1504_p5 }
 0x633   : > { %p1355_p11 = por %p1354_p10, %p1353_p9 }
 0x634   : > { %p1351_p8 = pneg %p1350_p7 }
 0x636   : > { %p1356_p12 = pnand %p1355_p11, %p1351_p8 }
 0x638   : > { %1359 = shalt.err (!%p1356_p12)
}
 0x639   : > { %s1399_s17 = smov 128   ;;  %s1400_s26 = smov 8   ;;  %v939_v16 = vmul.f32 %v1663_v46, %v1663_v46  ;;  %v938_v17 = vmul.f32 %v1656_v43, %v1656_v43  ;;  %v931_v19 = vadd.f32 %v1663_v46, %v1656_v43  ;;  %vm991_vm6 = vcmask 1040384  }
 0x63a   : > { %1244 = dma.vmem_to_hbm [thread:$0]  (%p1504_p5), %s1677_s16, 256, %s1675_s20, %s1681_s18, %s1399_s17, %s1399_s17, %s1400_s26   ;;  %vm993_vm7 = vcmask 1041408   ;;  %vm995_vm8 = vcmask 1042432  }
 0x63b   : > { %v940_v18 = vadd.f32 %v939_v16, %v938_v17  ;;  %v932_v21 = vrot.slane %v931_v19, 4  ;;  %p425_p5 = scmp.lt.s32.totalorder %s1487_s25, 3 }
 0x63d   : > { %v941_v20 = vrot.slane %v940_v18, 4  ;;  %v933_v23 = vadd.f32 %v932_v21, %v931_v19  ;;  %s1764_s25 = smov (!%p425_p5, %s1487_s25), 3 }
 0x63e   : > { %s1113_s13 = sshll.u32 %s1764_s25, 3 }
 0x63f   : > { %v942_v22 = vadd.f32 %v941_v20, %v940_v18  ;;  %v934_v25 = vrot.slane %v933_v23, 2  ;;  %s428_s15 = scalar_lea.vmem %s1744_s12, %s1113_s13 }
 0x641   : > { %v943_v24 = vrot.slane %v942_v22, 2  ;;  %v935_v27 = vadd.f32 %v934_v25, %v933_v23 }
 0x643   : > { %v944_v26 = vadd.f32 %v943_v24, %v942_v22  ;;  %v936_v29 = vrot.slane %v935_v27, 1 }
 0x645   : > { %v945_v28 = vrot.slane %v944_v26, 1  ;;  %v937_v31 = vadd.f32 %v936_v29, %v935_v27 }
 0x647   : > { %v946_v30 = vadd.f32 %v945_v28, %v944_v26 }
 0x649   : > { %v992_v33 = vsel %vm991_vm6, %v937_v31, %v946_v30 }
 0x6b6   : > { %v982_v9 = vpop.xlane.xlu0 %981 }
 0x6b7   : > { %v983_v10 = vrot.slane %v982_v9, 4 }
 0x6b9   : > { %v984_v11 = vadd.f32 %v983_v10, %v982_v9 }
 0x6bb   : > { %v985_v12 = vrot.slane %v984_v11, 2 }
 0x6bd   : > { %v986_v13 = vadd.f32 %v985_v12, %v984_v11 }
 0x6bf   : > { %v987_v14 = vrot.slane %v986_v13, 1 }
 0x6c1   : > { %v988_v15 = vadd.f32 %v987_v14, %v986_v13 }
 0x6c3   : > { %1242 = vpush %v988_v15 }
 0x6f4   : > { %s1243_s16 = spop %1242 }
 0x6f5   : > { %v990_v32 = vstv %s1243_s16 }
 0x6f6   : > { %v994_v34 = vsel %vm993_vm7, %v992_v33, %v990_v32 }
 0x6f7   : > { %v996_v35 = vsel %vm995_vm8, %v994_v34, 0.0 }
 0x6f8   : > { %997 = vst [vmem:[%s428_s15] sm:$0xff] %v996_v35 }
 0x6f9 PF: > { %p1250_p13 = scmp.ge.s32.totalorder %s1394_s24, 2  ;;  %s1034_s25 = sand.u32 1, %s1382_s21  }
 0x6fa   : > { %s1035_s28 = scalar_lea.sflag [#allocation3], %s1034_s25 }
 0x6fb   : > { %p1247_p0 = pnand %p1250_p13, %p1508_p6 }
 0x6fd   : > { %p1248_p1 = pneg %p1247_p0 }
 0x6ff   : > { %1377 = dma.done.wait (%p1248_p1), %s1035_s28, 256  }
 0x700   : > { %1379 = vsyncadd (%p1248_p1), %s1035_s28, 4294967040  ;;  %s1756_s24 = sld [smem:[#allocation6_spill]]  ;;  %s1759_s21 = smov %s1386_s22 }
 0x701   : > { %s1757_s27 = sld [smem:[#allocation5_spill]] }
 0x702   : > { %s1758_s23 = sld [smem:[#allocation7_spill]] }
 0x706   : > { %p23_p2 = scmp.ge.s32.totalorder %s1756_s24, 6  }
 0x707   : > { %s1760_s22 = smov %s1757_s27 }
 0x708   :  { %25 = sbr.rel (!%p23_p2) target bundleno = 3 (0x3), region = 111 }
 0x70d   :  { %1047 = vsyncpa [#allocation3], 1 }
 0x70e   :  { %1049 = vsyncpa [#allocation3 + $0x1], 1 }

</bundles_post_ra>
